<compile_context>
chip_gen: v5e
topology: v5e:2x2
jax: 0.10.0
libtpu: 0.0.40
codegen_flags: <defaults>
</compile_context>

<pallas_src>
import jax
import jax.numpy as jnp
from jax.experimental import pallas as pl
from jax.experimental.pallas import tpu as pltpu

_LANE = 128
_SUBLANE = 8
# f32 temporaries materialized per element inside the kernel body (x_f32, e,
# plus slack for the cast/broadcast) -- counted so block sizing reflects the
# real per-step VMEM footprint, not just the input bytes.
_F32_TEMPS = 3


def _round_up(a, b):
    return (a + b - 1) // b * b


def _vmem_budget():
    """(vmem_limit_bytes, per-grid-step byte budget) derived from the chip."""
    try:
        cap = int(getattr(pltpu.get_tpu_info(), "vmem_capacity_bytes", 0) or 0)
    except Exception:
        cap = 0
    if cap <= 0:
        cap = 64 * 1024 * 1024  # assume the smallest generation (v7x: 64 MiB / TC)
    vmem_limit = min((cap * 3) // 4, 96 * 1024 * 1024)  # 96 MiB v5e/v6e, 48 MiB v7x
    budget = (vmem_limit * 3) // 4                      # headroom for pipelining/overheads
    return vmem_limit, budget


def _per_elem_bytes(in_dtype, out_dtype):
    # 2x double-buffered input + 2x double-buffered output + f32 intermediates.
    return (2 * jnp.dtype(in_dtype).itemsize
            + 2 * jnp.dtype(out_dtype).itemsize
            + 4 * _F32_TEMPS)


# ---------------------------------------------------------------------------
# Kernels
# ---------------------------------------------------------------------------

def _softmax_last_kernel(x_ref, o_ref):
    # (block_rows, D): softmax over the last (lane) axis.
    x = x_ref[...].astype(jnp.float32)
    m = jnp.max(x, axis=-1, keepdims=True)
    e = jnp.exp(x - m)                                   # EUP
    inv = 1.0 / jnp.sum(e, axis=-1, keepdims=True)       # exact: ONE divide per row
    o_ref[...] = (e * inv).astype(o_ref.dtype)           # VPU multiply per element


def _softmax_mid_kernel(x_ref, o_ref):
    # (block_pre, D, post): softmax over the middle (sublane) axis; the lane
    # axis (post) stays dense so no transpose is required.
    x = x_ref[...].astype(jnp.float32)
    m = jnp.max(x, axis=1, keepdims=True)
    e = jnp.exp(x - m)
    inv = 1.0 / jnp.sum(e, axis=1, keepdims=True)         # one divide per (pre, post)
    o_ref[...] = (e * inv).astype(o_ref.dtype)


def _make_stats_kernel(d_total, block_d):
    """Pass 1 of the D-tiled path: per-row running max + normalizer (stored as 1/l)."""
    def kernel(x_ref, m_ref, invl_ref):
        k = pl.program_id(1)

        @pl.when(k == 0)
        def _():
            m_ref[...] = jnp.full_like(m_ref, -jnp.inf)
            invl_ref[...] = jnp.zeros_like(invl_ref)

        x = x_ref[...].astype(jnp.float32)
        # Mask the ragged last D block so padded columns don't pollute max/sum.
        col = jax.lax.broadcasted_iota(jnp.int32, x.shape, 1) + k * block_d
        x = jnp.where(col < d_total, x, -jnp.inf)

        m_prev = m_ref[...]
        m_new = jnp.maximum(m_prev, jnp.max(x, axis=-1, keepdims=True))
        invl_ref[...] = (invl_ref[...] * jnp.exp(m_prev - m_new)
                         + jnp.sum(jnp.exp(x - m_new), axis=-1, keepdims=True))
        m_ref[...] = m_new

        @pl.when(k == pl.num_programs(1) - 1)
        def _():
            invl_ref[...] = 1.0 / invl_ref[...]           # one divide per row, total
    return kernel


def _softmax_norm_large_d_kernel(x_ref, m_ref, invl_ref, o_ref):
    # Pass 2: elementwise exp(x - m) * (1/l); fully parallel over rows and D.
    x = x_ref[...].astype(jnp.float32)
    o_ref[...] = (jnp.exp(x - m_ref[...]) * invl_ref[...]).astype(o_ref.dtype)


# ---------------------------------------------------------------------------
# pallas_call wrappers
# ---------------------------------------------------------------------------

def _softmax_last_full_d(x2d, out_dtype, vmem_limit, budget):
    rows, d = x2d.shape
    per_row = _round_up(d, _LANE) * _per_elem_bytes(x2d.dtype, out_dtype)
    block_rows = max(_SUBLANE, (budget // per_row) // _SUBLANE * _SUBLANE)
    block_rows = min(block_rows, _round_up(rows, _SUBLANE))
    # >= 2 grid steps so v7x megacore can shard; >= 8 when there are enough rows.
    min_steps = 8 if rows >= 8 * _SUBLANE else (2 if rows > _SUBLANE else 1)
    if min_steps > 1:
        block_rows = min(block_rows, _round_up(pl.cdiv(rows, min_steps), _SUBLANE))
    grid = (pl.cdiv(rows, block_rows),)
    return pl.pallas_call(
        _softmax_last_kernel,
        out_shape=jax.ShapeDtypeStruct((rows, d), out_dtype),
        grid=grid,
        in_specs=[pl.BlockSpec((block_rows, d), lambda i: (i, 0))],
        out_specs=pl.BlockSpec((block_rows, d), lambda i: (i, 0)),
        compiler_params=pltpu.CompilerParams(
            dimension_semantics=("parallel",),
            vmem_limit_bytes=vmem_limit),
    )(x2d)


def _softmax_last_large_d(x2d, out_dtype, vmem_limit, budget,
                          block_rows=None, block_d=None):
    """Two-pass, D-tiled softmax over the last axis; VMEM bounded independent of D."""
    rows, d = x2d.shape
    per_elem = _per_elem_bytes(x2d.dtype, out_dtype)
    if block_rows is None:
        block_rows = min(_round_up(rows, _SUBLANE), 64)
    if block_d is None:
        block_d = max(_LANE, (budget // (block_rows * per_elem)) // _LANE * _LANE)
        block_d = min(block_d, _round_up(d, _LANE))
    row_blocks = pl.cdiv(rows, block_rows)
    d_blocks = pl.cdiv(d, block_d)

    # Pass 1: per-row running max + normalizer (stored as 1/l), D axis "arbitrary".
    m, inv_l = pl.pallas_call(
        _make_stats_kernel(d, block_d),
        out_shape=(jax.ShapeDtypeStruct((rows, 1), jnp.float32),
                   jax.ShapeDtypeStruct((rows, 1), jnp.float32)),
        grid=(row_blocks, d_blocks),
        in_specs=[pl.BlockSpec((block_rows, block_d), lambda i, k: (i, k))],
        out_specs=(pl.BlockSpec((block_rows, 1), lambda i, k: (i, 0)),
                   pl.BlockSpec((block_rows, 1), lambda i, k: (i, 0))),
        compiler_params=pltpu.CompilerParams(
            dimension_semantics=("parallel", "arbitrary"),
            vmem_limit_bytes=vmem_limit),
    )(x2d)

    # Pass 2: elementwise normalize; fully parallel (both axes shardable).
    return pl.pallas_call(
        _softmax_norm_large_d_kernel,
        out_shape=jax.ShapeDtypeStruct((rows, d), out_dtype),
        grid=(row_blocks, d_blocks),
        in_specs=[pl.BlockSpec((block_rows, block_d), lambda i, k: (i, k)),
                  pl.BlockSpec((block_rows, 1), lambda i, k: (i, 0)),
                  pl.BlockSpec((block_rows, 1), lambda i, k: (i, 0))],
        out_specs=pl.BlockSpec((block_rows, block_d), lambda i, k: (i, k)),
        compiler_params=pltpu.CompilerParams(
            dimension_semantics=("parallel", "parallel"),
            vmem_limit_bytes=vmem_limit),
    )(x2d, m, inv_l)


def _softmax_mid(x3d, out_dtype, vmem_limit, budget):
    pre, d, post = x3d.shape
    # Account for (8,128) padding of the (d, post) slab in VMEM.
    per_pre = (_round_up(d, _SUBLANE) * _round_up(post, _LANE)
               * _per_elem_bytes(x3d.dtype, out_dtype))
    block_pre = max(1, budget // per_pre)
    block_pre = min(block_pre, pre)
    min_steps = 8 if pre >= 8 else (2 if pre >= 2 else 1)
    if min_steps > 1:
        block_pre = min(block_pre, pl.cdiv(pre, min_steps))
    # TODO(synk): if a single (d, post) slab exceeds the VMEM budget (huge d*post),
    # this still runs with block_pre=1 but may spill; tile `post` with a second
    # parallel grid axis in that case.
    grid = (pl.cdiv(pre, block_pre),)
    return pl.pallas_call(
        _softmax_mid_kernel,
        out_shape=jax.ShapeDtypeStruct((pre, d, post), out_dtype),
        grid=grid,
        in_specs=[pl.BlockSpec((block_pre, d, post), lambda i: (i, 0, 0))],
        out_specs=pl.BlockSpec((block_pre, d, post), lambda i: (i, 0, 0)),
        compiler_params=pltpu.CompilerParams(
            dimension_semantics=("parallel",),
            vmem_limit_bytes=vmem_limit),
    )(x3d)


def softmax_pallas(x, dim, approx_mode="no_approx", approx_degree=3, exp_table_size=1):
    """Softmax over `dim` via Pallas TPU kernels (matches F.softmax(dim=dim))."""
    # TODO(synk): the proprietary `approx.softmax_approx_poly` / `softmax_approx_lut`
    # exp approximations (degree / exp_table_size) are not public; approx modes use
    # the exact exp but keep the module's `.float()` output cast.
    del approx_degree, exp_table_size
    ndim = x.ndim
    axis = dim % ndim
    out_dtype = x.dtype if approx_mode == "no_approx" else jnp.float32

    shape = x.shape
    d = shape[axis]
    pre = 1
    for s in shape[:axis]:
        pre *= s
    post = 1
    for s in shape[axis + 1:]:
        post *= s

    vmem_limit, budget = _vmem_budget()

    if post == 1:
        # Softmax axis is (effectively) the last axis: (rows, D), lane reduce.
        rows = pre
        x2d = x.reshape(rows, d)
        per_row = _round_up(d, _LANE) * _per_elem_bytes(x.dtype, out_dtype)
        if _SUBLANE * per_row > budget:
            # Even an 8-row full-D block would blow the per-step budget (vocab-scale
            # D, or v7x's smaller VMEM) -> D-tiled two-pass path.
            out = _softmax_last_large_d(x2d, out_dtype, vmem_limit, budget)
        else:
            out = _softmax_last_full_d(x2d, out_dtype, vmem_limit, budget)
        return out.reshape(shape)

    # General case: (pre, D, post); reduce over the middle (sublane) axis.
    # NOTE: all trailing dims collapse into `post`; post >= 128 is the lane-dense
    # fast path (small `post` produces masked partial stores and is slower).
    x3d = x.reshape(pre, d, post)
    return _softmax_mid(x3d, out_dtype, vmem_limit, budget).reshape(shape)


if __name__ == "__main__":
    key = jax.random.PRNGKey(0)
    k0, k1 = jax.random.split(key)
    # NCHW-style input, as the quantized module would see from a conv/attention stack.
    x = jax.random.normal(k0, (2, 4, 16, 16), dtype=jnp.float32)

    # no_approx, dim = -1  (softmax over the last / lane axis).
    y_last = jax.block_until_ready(softmax_pallas(x, dim=-1, approx_mode="no_approx"))
    ref_last = jax.nn.softmax(x, axis=-1)
    assert y_last.shape == x.shape and y_last.dtype == x.dtype
    assert jnp.allclose(y_last, ref_last, atol=1e-6, rtol=1e-5)

    # no_approx, dim = 1  (channel softmax; reduced over the sublane axis, no transpose).
    y_ch = jax.block_until_ready(softmax_pallas(x, dim=1, approx_mode="no_approx"))
    ref_ch = jax.nn.softmax(x, axis=1)
    assert y_ch.shape == x.shape and y_ch.dtype == x.dtype
    assert jnp.allclose(y_ch, ref_ch, atol=1e-6, rtol=1e-5)

    # approx ("poly") mode: exact exp fallback + the module's .float() output cast.
    y_poly = jax.block_until_ready(
        softmax_pallas(x, dim=-1, approx_mode="poly", approx_degree=3, exp_table_size=1))
    assert y_poly.dtype == jnp.float32
    assert jnp.allclose(y_poly, ref_last.astype(jnp.float32), atol=1e-6, rtol=1e-5)

    # Exercise the D-tiled two-pass (large-D) path with forced small blocks so the
    # ragged-row and ragged-last-D-block masking is validated at a small shape.
    xb = jax.random.normal(k1, (40, 320), dtype=jnp.float32)
    vmem_limit, budget = _vmem_budget()
    y_big = jax.block_until_ready(
        _softmax_last_large_d(xb, jnp.float32, vmem_limit, budget,
                              block_rows=16, block_d=128))
    assert jnp.allclose(y_big, jax.nn.softmax(xb, axis=-1), atol=1e-6, rtol=1e-5)

    print("KERNEL_OK")
</pallas_src>

<mosaic_0001>
module attributes {stable_mosaic.version = 11 : i64} {
  func.func @_softmax_last_kernel(%arg0: i32, %arg1: memref<16x16xf32, #tpu.memory_space<vmem>>, %arg2: memref<16x16xf32, #tpu.memory_space<vmem>>) attributes {dimension_semantics = [#tpu.dimension_semantics<parallel>], iteration_bounds = array<i64: 8>, scalar_prefetch = 0 : i64, scratch_operands = 0 : i64, tpu.core_type = #tpu.core_type<tc>, window_params = [{transform_indices = @transform_0, window_bounds = array<i64: 16, 16>}, {transform_indices = @transform_1, window_bounds = array<i64: 16, 16>}]} {
    %c0 = arith.constant 0 : index
    %c0_0 = arith.constant 0 : index
    %0 = vector.load %arg1[%c0, %c0_0] : memref<16x16xf32, #tpu.memory_space<vmem>>, vector<16x16xf32>
    %cst = arith.constant dense<0xFF800000> : vector<16xf32>
    %1 = vector.multi_reduction <maximumf>, %0, %cst [1] : vector<16x16xf32> to vector<16xf32>
    %2 = vector.shape_cast %1 : vector<16xf32> to vector<16x1xf32>
    %3 = vector.broadcast %2 : vector<16x1xf32> to vector<16x16xf32>
    %4 = arith.subf %0, %3 : vector<16x16xf32>
    %5 = math.exp %4 : vector<16x16xf32>
    %cst_1 = arith.constant dense<0.000000e+00> : vector<16xf32>
    %6 = vector.multi_reduction <add>, %5, %cst_1 [1] : vector<16x16xf32> to vector<16xf32>
    %7 = vector.shape_cast %6 : vector<16xf32> to vector<16x1xf32>
    %cst_2 = arith.constant 1.000000e+00 : f32
    %8 = vector.broadcast %cst_2 : f32 to vector<16x1xf32>
    %9 = arith.divf %8, %7 : vector<16x1xf32>
    %10 = vector.broadcast %9 : vector<16x1xf32> to vector<16x16xf32>
    %11 = arith.mulf %5, %10 : vector<16x16xf32>
    %c0_3 = arith.constant 0 : index
    %c0_4 = arith.constant 0 : index
    %12 = vector.load %arg2[%c0_3, %c0_4] : memref<16x16xf32, #tpu.memory_space<vmem>>, vector<16x16xf32>
    tpu.vector_store %arg2[%c0_3, %c0_4], %11 {strides = array<i32>} : memref<16x16xf32, #tpu.memory_space<vmem>>, vector<16x16xf32>,
    return
  }
  func.func @transform_0(%arg0: i32) -> (i32, i32) {
    %c0_i32 = arith.constant 0 : i32
    %c0_i32_0 = arith.constant 0 : i32
    return %arg0, %c0_i32 : i32, i32
  }
  func.func @transform_1(%arg0: i32) -> (i32, i32) {
    %c0_i32 = arith.constant 0 : i32
    %c0_i32_0 = arith.constant 0 : i32
    return %arg0, %c0_i32 : i32, i32
  }
}

</mosaic_0001>

<bundles_post_ra>
// kernel: tpu_custom_call.1
= control target key start
LH: loop header
LB: loop body
LE: loop exit
PB: predicated region body
PF: predicated region fallthrough
CT: control target
= control target key end

     0   :  { %s276_s6 = smov 0   ;;  %s306_s0 = inlined_call_operand.vmem [shape: f32[128,16], index: 0, kind: input, shape index: {}]   ;;  %s307_s1 = inlined_call_operand.vmem [shape: f32[128,16], index: 1, kind: output, shape index: {}]  }
   0x1 LB: > { %s231_s7 = sadd.s32 4294967295, %s264_s6   ;;  %p235_p0 = scmp.ge.s32.totalorder %s264_s6, 1  ;;  %s264_s6 = sphi %s276_s6, %s11_s6  }
   0x2   : > { %p88_p1 = scmp.lt.s32.totalorder %s264_s6, 9 }
   0x4   : > { %p89_p2 = pnand %p235_p0, %p88_p1 }
   0x5   : > { %s236_s8 = sshll.u32 (!%p89_p2), %s231_s7, 1 }
   0x6   : > { %92 = sbr.rel (%p89_p2) target bundleno = 288 (0x120), region = 24  ;;  %p109_p3 = scmp.lt.s32.totalorder (!%p89_p2), %s236_s8, 15 }
   0xb   : > { %s309_s8 = smov (!%p109_p3, %s236_s8), 15  ;;  %vm122_vm0 = vcmask 130048  }
   0xc   : > { %s237_s9 = sshll.u32 %s309_s8, 3 }
   0xd   : > { %s112_s12 = scalar_lea.vmem %s306_s0, %s237_s9  ;;  %s118_s15 = scalar_lea.vmem %s307_s1, %s237_s9 }
   0xe   : > { %v120_v0 = vld [vmem:[%s112_s12] sm:$0xff]  ;;  %v121_v2 = vld [vmem:[%s112_s12 + $0x8] sm:$0xff] }
   0xf   : > { %v123_v1 = vsel %vm122_vm0, %v120_v0, -inf  ;;  %v126_v3 = vsel %vm122_vm0, %v121_v2, -inf }
  0x10   : > { %124 = vmax.xlane.f32.xlu0 %v123_v1 }
  0x18   : > { %127 = vmax.xlane.f32.xlu0 %v126_v3 }
  0x83   : > { %v125_v4 = vpop.xlane.xlu0 %124 }
  0x84   : > { %v129_v5 = vsub.f32 %v120_v0, %v125_v4 }
  0x86   : > { %v131_v6 = vmul.f32 1.442695, %v129_v5 }
  0x88   : > { %250 = vpow2.f32 %v131_v6 }
  0x8b   : > { %v128_v7 = vpop.xlane.xlu0 %127 }
  0x8c   : > { %v130_v8 = vsub.f32 %v121_v2, %v128_v7 }
  0x8e   : > { %v251_v9 = vpop.eup %250  ;;  %v133_v10 = vmul.f32 1.442695, %v130_v8 }
  0x8f   : > { %v135_v11 = vsel %vm122_vm0, %v251_v9, 0.0 }
  0x90   : > { %252 = vpow2.f32 %v133_v10  ;;  %136 = vadd.xlane.f32.xlu1 %v135_v11 }
  0x96   : > { %v253_v12 = vpop.eup %252 }
  0x97   : > { %v138_v13 = vsel %vm122_vm0, %v253_v12, 0.0 }
  0x98   : > { %139 = vadd.xlane.f32.xlu1 %v138_v13 }
 0x103   : > { %v137_v14 = vpop.xlane.xlu1 %136 }
 0x104   : > { %254 = vrcp.f32 %v137_v14  ;;  %v152_v19 = vand.u32 2147483648, %v137_v14  ;;  %v150_v21 = vand.u32 2147483647, %v137_v14  ;;  %vm146_vm2 = vweird.f32 %v137_v14 }
 0x106   : > { %v153_v24 = vor.u32 1.1754944e-38, %v152_v19  ;;  %vm151_vm4 = vcmp.eq.f32.partialorder %v150_v21, 8.507059e+37 }
 0x10a   : > { %v255_v15 = vpop.eup %254 }
 0x10b   : > { %v142_v16 = vmul.f32 %v255_v15, %v137_v14  ;;  %v140_v17 = vpop.xlane.xlu1 %139  ;;  %vm147_vm1 = vweird.f32 %v255_v15 }
 0x10c   : > { %256 = vrcp.f32 %v140_v17  ;;  %vm148_vm3 = vmor %vm146_vm2, %vm147_vm1  ;;  %v167_v30 = vand.u32 2147483648, %v140_v17  ;;  %v165_v32 = vand.u32 2147483647, %v140_v17  ;;  %vm161_vm6 = vweird.f32 %v140_v17 }
 0x10d   : > { %v143_v18 = vsub.f32 1.0, %v142_v16 }
 0x10e   : > { %v168_v34 = vor.u32 1.1754944e-38, %v167_v30  ;;  %vm166_vm8 = vcmp.eq.f32.partialorder %v165_v32, 8.507059e+37 }
 0x10f   : > { %v144_v20 = vmul.f32 %v255_v15, %v143_v18 }
 0x111   : > { %v145_v22 = vadd.f32 %v255_v15, %v144_v20 }
 0x112   : > { %v257_v23 = vpop.eup %256 }
 0x113   : > { %v149_v25 = vsel %vm148_vm3, %v255_v15, %v145_v22  ;;  %v157_v26 = vmul.f32 %v257_v23, %v140_v17  ;;  %vm162_vm5 = vweird.f32 %v257_v23 }
 0x114   : > { %v154_v27 = vsel %vm151_vm4, %v153_v24, %v149_v25  ;;  %vm163_vm7 = vmor %vm161_vm6, %vm162_vm5 }
 0x115   : > { %v171_v28 = vmul.f32 %v251_v9, %v154_v27  ;;  %v158_v29 = vsub.f32 1.0, %v157_v26 }
 0x117   : > { %173 = vst.msk [vmem:[%s118_s15] sm:$0xff] %vm122_vm0, %v171_v28  ;;  %v159_v31 = vmul.f32 %v257_v23, %v158_v29 }
 0x119   : > { %v160_v33 = vadd.f32 %v257_v23, %v159_v31 }
 0x11b   : > { %v164_v35 = vsel %vm163_vm7, %v257_v23, %v160_v33 }
 0x11c   : > { %v169_v36 = vsel %vm166_vm8, %v168_v34, %v164_v35 }
 0x11d   : > { %v172_v37 = vmul.f32 %v253_v12, %v169_v36 }
 0x11f   : > { %174 = vst.msk [vmem:[%s118_s15 + $0x8] sm:$0xff] %vm122_vm0, %v172_v37 }
 0x120 PF: > { %s11_s6 = sadd.s32 1, %s264_s6  }
 0x121   : > { %p8_p4 = scmp.ge.s32.totalorder %s11_s6, 10  }
 0x123   :  { %10 = sbr.rel (!%p8_p4) target bundleno = 1 (0x1), region = 54 }

</bundles_post_ra>
